<compile_context>
chip_gen: v6e
topology: v6e:2x2x1
jax: 0.10.0
libtpu: 0.0.40
codegen_flags: <defaults>
</compile_context>

<pallas_src>
import jax
import jax.numpy as jnp
from jax.experimental import pallas as pl
from jax.experimental.pallas import tpu as pltpu


def _round_up(x, m):
    return ((x + m - 1) // m) * m


def _rec_kernel(madj_ref, x_ref, norm_in_ref, o_ref):
    """Inner tile: masked-adjacency matmul with f32 accumulation directly in o_ref.

    madj_ref    : [tm, tk] bf16  precomputed (adj * mask) tile (0/1 values, exact)
    x_ref       : [tk, tn] bf16  src features, already scaled by deg_out^-1/2
    norm_in_ref : [tm, 1]  f32   deg_in^-1/2 for this dst tile
    o_ref       : [tm, tn] f32   output tile; doubles as the accumulator (block index
                                 is constant across the reduction axis k)
    """
    k = pl.program_id(2)

    @pl.when(k == 0)
    def _():
        o_ref[...] = jnp.zeros_like(o_ref)

    # bf16 x bf16 MXU matmul, f32 accumulation.
    o_ref[...] += jnp.dot(madj_ref[...], x_ref[...],
                          preferred_element_type=jnp.float32)

    @pl.when(k == pl.num_programs(2) - 1)
    def _():
        # dst-side normalization applied once, at finalize only (in place).
        o_ref[...] = o_ref[...] * norm_in_ref[...]


def rec_layer_graph_constants(adj, edge_mask):
    """Graph-constant preprocessing.

    For a static graph/mask reused across forward calls, hoist this out of the hot path.
    Returns:
      masked_adj : [N_dst, N_src] bf16   (adj * mask), 0/1 -> exact in bf16
      norm_out   : [N_src]        f32    deg_out^-1/2 (structural, clamped to >=1)
      norm_in    : [N_dst, 1]     f32    deg_in^-1/2  (structural, clamped to >=1)
    """
    adj_f = adj.astype(jnp.float32)
    deg_out = jnp.maximum(jnp.sum(adj_f, axis=0), 1.0)         # out-degree of src [N_src]
    deg_in = jnp.maximum(jnp.sum(adj_f, axis=1), 1.0)          # in-degree of dst  [N_dst]
    norm_out = jax.lax.rsqrt(deg_out)
    norm_in = jax.lax.rsqrt(deg_in)[:, None]
    masked_adj = (adj_f * edge_mask.astype(jnp.float32)).astype(jnp.bfloat16)
    return masked_adj, norm_out, norm_in


def rec_layer_forward(adj, edge_mask, x, *, tm=512, tn=512, tk=1024):
    """Pallas wrapper.

    adj       : [N_dst, N_src] (0/1) structural adjacency
    edge_mask : [N_dst, N_src] per-edge mask
    x         : [N_src, F]     source node features (h[src])
    returns   : [N_dst, F]     float32
    """
    n_dst, n_src = adj.shape
    f = x.shape[1]

    masked_adj, norm_out, norm_in = rec_layer_graph_constants(adj, edge_mask)

    # Fold the src-side normalization into the features (f32), then round once to bf16.
    feat_src = (x.astype(jnp.float32) * norm_out[:, None]).astype(jnp.bfloat16)

    # Clamp tiles to the (aligned) problem size, keeping TPU tiling constraints.
    tm = min(tm, _round_up(n_dst, 8))
    tk = min(tk, _round_up(n_src, 128))
    tn = min(tn, _round_up(f, 128))
    pm, pk, pn = _round_up(n_dst, tm), _round_up(n_src, tk), _round_up(f, tn)

    # Zero-pad to tile multiples (padding contributes exact zeros to the reduction).
    madj_p = jnp.zeros((pm, pk), jnp.bfloat16).at[:n_dst, :n_src].set(masked_adj)
    x_p = jnp.zeros((pk, pn), jnp.bfloat16).at[:n_src, :f].set(feat_src)
    nin_p = jnp.zeros((pm, 1), jnp.float32).at[:n_dst, :].set(norm_in)

    grid = (pm // tm, pn // tn, pk // tk)

    out_p = pl.pallas_call(
        _rec_kernel,
        out_shape=jax.ShapeDtypeStruct((pm, pn), jnp.float32),
        grid_spec=pltpu.PrefetchScalarGridSpec(
            num_scalar_prefetch=0,
            grid=grid,
            in_specs=[
                pl.BlockSpec((tm, tk), lambda i, j, k: (i, k)),   # masked adjacency tile
                pl.BlockSpec((tk, tn), lambda i, j, k: (k, j)),   # pre-scaled bf16 features
                pl.BlockSpec((tm, 1), lambda i, j, k: (i, 0)),    # dst-side norm
            ],
            out_specs=pl.BlockSpec((tm, tn), lambda i, j, k: (i, j)),
        ),
        compiler_params=pltpu.CompilerParams(
            dimension_semantics=("parallel", "parallel", "arbitrary"),
            vmem_limit_bytes=48 * 1024 * 1024),
    )(madj_p, x_p, nin_p)

    return out_p[:n_dst, :f]


def rec_layer_reference(adj, edge_mask, x):
    """Pure-JAX f32 reference mirroring the PyTorch/DGL forward."""
    adj = adj.astype(jnp.float32)
    deg_out = jnp.maximum(adj.sum(axis=0), 1.0)                 # out_degrees of src
    feat_src = x.astype(jnp.float32) * (deg_out ** -0.5)[:, None]
    agg = (adj * edge_mask.astype(jnp.float32)) @ feat_src      # masked sum over mailbox
    deg_in = jnp.maximum(adj.sum(axis=1), 1.0)                  # in_degrees of dst
    return agg * (deg_in ** -0.5)[:, None]


def rec_layer_reference_bf16(adj, edge_mask, x):
    """Reference mirroring the kernel's bf16 input rounding (f32 accumulation)."""
    adj = adj.astype(jnp.float32)
    deg_out = jnp.maximum(adj.sum(axis=0), 1.0)
    norm_out = jax.lax.rsqrt(deg_out)
    feat_src = (x.astype(jnp.float32) * norm_out[:, None]).astype(jnp.bfloat16)
    madj = (adj * edge_mask.astype(jnp.float32)).astype(jnp.bfloat16)
    agg = madj.astype(jnp.float32) @ feat_src.astype(jnp.float32)
    deg_in = jnp.maximum(adj.sum(axis=1), 1.0)
    return agg * jax.lax.rsqrt(deg_in)[:, None]


if __name__ == "__main__":
    key = jax.random.PRNGKey(0)

    # --- Test 1: small shapes, single-tile grid ---
    k_adj, k_mask, k_x = jax.random.split(key, 3)
    N_SRC, N_DST, F = 16, 8, 32
    adj = jax.random.bernoulli(k_adj, p=0.5, shape=(N_DST, N_SRC)).astype(jnp.float32)
    edge_mask = jax.random.bernoulli(k_mask, p=0.7, shape=(N_DST, N_SRC)).astype(jnp.float32)
    x = jax.random.normal(k_x, (N_SRC, F), dtype=jnp.float32)

    out = jax.block_until_ready(rec_layer_forward(adj, edge_mask, x))
    assert out.shape == (N_DST, F)
    ref_bf16 = rec_layer_reference_bf16(adj, edge_mask, x)
    ref_f32 = rec_layer_reference(adj, edge_mask, x)
    assert jnp.allclose(out, ref_bf16, atol=1e-3, rtol=1e-3), "mismatch vs bf16-aware ref (t1)"
    assert jnp.allclose(out, ref_f32, atol=3e-2, rtol=3e-2), "mismatch vs f32 ref (t1)"

    # --- Test 2: multi-tile grid exercising the reduction axis and padding ---
    k_adj2, k_mask2, k_x2 = jax.random.split(jax.random.PRNGKey(1), 3)
    N_SRC2, N_DST2, F2 = 500, 60, 200
    adj2 = jax.random.bernoulli(k_adj2, p=0.1, shape=(N_DST2, N_SRC2)).astype(jnp.float32)
    mask2 = jax.random.bernoulli(k_mask2, p=0.7, shape=(N_DST2, N_SRC2)).astype(jnp.float32)
    x2 = jax.random.normal(k_x2, (N_SRC2, F2), dtype=jnp.float32)

    out2 = jax.block_until_ready(
        rec_layer_forward(adj2, mask2, x2, tm=32, tn=128, tk=128))
    assert out2.shape == (N_DST2, F2)
    ref2_bf16 = rec_layer_reference_bf16(adj2, mask2, x2)
    ref2_f32 = rec_layer_reference(adj2, mask2, x2)
    assert jnp.allclose(out2, ref2_bf16, atol=1e-3, rtol=1e-3), "mismatch vs bf16-aware ref (t2)"
    assert jnp.allclose(out2, ref2_f32, atol=3e-2, rtol=3e-2), "mismatch vs f32 ref (t2)"

    print("KERNEL_OK")
</pallas_src>

<mosaic_0001>
module attributes {stable_mosaic.version = 11 : i64} {
  func.func @_rec_kernel(%arg0: i32, %arg1: i32, %arg2: i32, %arg3: memref<8x128xbf16, #tpu.memory_space<vmem>>, %arg4: memref<128x128xbf16, #tpu.memory_space<vmem>>, %arg5: memref<8x1xf32, #tpu.memory_space<vmem>>, %arg6: memref<8x128xf32, #tpu.memory_space<vmem>>) attributes {dimension_semantics = [#tpu.dimension_semantics<parallel>, #tpu.dimension_semantics<parallel>, #tpu.dimension_semantics<arbitrary>], iteration_bounds = array<i64: 1, 1, 1>, scalar_prefetch = 0 : i64, scratch_operands = 0 : i64, tpu.core_type = #tpu.core_type<tc>, window_params = [{transform_indices = @transform_0, window_bounds = array<i64: 8, 128>}, {transform_indices = @transform_1, window_bounds = array<i64: 128, 128>}, {transform_indices = @transform_2, window_bounds = array<i64: 8, 1>}, {transform_indices = @transform_3, window_bounds = array<i64: 8, 128>}]} {
    %c0_i32 = arith.constant 0 : i32
    %0 = arith.cmpi eq, %arg2, %c0_i32 : i32
    %1 = arith.extui %0 : i1 to i32
    %c0_i32_0 = arith.constant 0 : i32
    %2 = arith.cmpi ne, %1, %c0_i32_0 : i32
    scf.if %2 {
      %cst_10 = arith.constant 0.000000e+00 : f32
      %12 = vector.broadcast %cst_10 : f32 to vector<8x128xf32>
      %c0_11 = arith.constant 0 : index
      %c0_12 = arith.constant 0 : index
      %13 = vector.load %arg6[%c0_11, %c0_12] : memref<8x128xf32, #tpu.memory_space<vmem>>, vector<8x128xf32>
      tpu.vector_store %arg6[%c0_11, %c0_12], %12 {strides = array<i32>} : memref<8x128xf32, #tpu.memory_space<vmem>>, vector<8x128xf32>,
    } else {
    }
    %c0 = arith.constant 0 : index
    %c0_1 = arith.constant 0 : index
    %3 = vector.load %arg6[%c0, %c0_1] : memref<8x128xf32, #tpu.memory_space<vmem>>, vector<8x128xf32>
    %c0_2 = arith.constant 0 : index
    %c0_3 = arith.constant 0 : index
    %4 = vector.load %arg3[%c0_2, %c0_3] : memref<8x128xbf16, #tpu.memory_space<vmem>>, vector<8x128xbf16>
    %c0_4 = arith.constant 0 : index
    %c0_5 = arith.constant 0 : index
    %5 = vector.load %arg4[%c0_4, %c0_5] : memref<128x128xbf16, #tpu.memory_space<vmem>>, vector<128x128xbf16>
    %cst = arith.constant dense<0.000000e+00> : vector<8x128xf32>
    %6 = tpu.matmul %4, %5, %cst {dimension_numbers = #tpu.dot_dimension_numbers<[1], [0], [0], [1], [0, 0, 1, 1], [], []>} : vector<8x128xbf16>, vector<128x128xbf16>, vector<8x128xf32> -> vector<8x128xf32>
    %7 = arith.addf %3, %6 : vector<8x128xf32>
    %c0_6 = arith.constant 0 : index
    %c0_7 = arith.constant 0 : index
    %8 = vector.load %arg6[%c0_6, %c0_7] : memref<8x128xf32, #tpu.memory_space<vmem>>, vector<8x128xf32>
    tpu.vector_store %arg6[%c0_6, %c0_7], %7 {strides = array<i32>} : memref<8x128xf32, #tpu.memory_space<vmem>>, vector<8x128xf32>,
    %c0_i32_8 = arith.constant 0 : i32
    %9 = arith.cmpi eq, %arg2, %c0_i32_8 : i32
    %10 = arith.extui %9 : i1 to i32
    %c0_i32_9 = arith.constant 0 : i32
    %11 = arith.cmpi ne, %10, %c0_i32_9 : i32
    scf.if %11 {
      %c0_10 = arith.constant 0 : index
      %c0_11 = arith.constant 0 : index
      %12 = vector.load %arg6[%c0_10, %c0_11] : memref<8x128xf32, #tpu.memory_space<vmem>>, vector<8x128xf32>
      %c0_12 = arith.constant 0 : index
      %c0_13 = arith.constant 0 : index
      %13 = vector.load %arg5[%c0_12, %c0_13] : memref<8x1xf32, #tpu.memory_space<vmem>>, vector<8x1xf32>
      %14 = vector.broadcast %13 : vector<8x1xf32> to vector<8x128xf32>
      %15 = arith.mulf %12, %14 : vector<8x128xf32>
      %c0_14 = arith.constant 0 : index
      %c0_15 = arith.constant 0 : index
      %16 = vector.load %arg6[%c0_14, %c0_15] : memref<8x128xf32, #tpu.memory_space<vmem>>, vector<8x128xf32>
      tpu.vector_store %arg6[%c0_14, %c0_15], %15 {strides = array<i32>} : memref<8x128xf32, #tpu.memory_space<vmem>>, vector<8x128xf32>,
    } else {
    }
    return
  }
  func.func @transform_0(%arg0: i32, %arg1: i32, %arg2: i32) -> (i32, i32) {
    %c0_i32 = arith.constant 0 : i32
    return %arg0, %arg2 : i32, i32
  }
  func.func @transform_1(%arg0: i32, %arg1: i32, %arg2: i32) -> (i32, i32) {
    %c0_i32 = arith.constant 0 : i32
    return %arg2, %arg1 : i32, i32
  }
  func.func @transform_2(%arg0: i32, %arg1: i32, %arg2: i32) -> (i32, i32) {
    %c0_i32 = arith.constant 0 : i32
    %c0_i32_0 = arith.constant 0 : i32
    return %arg0, %c0_i32 : i32, i32
  }
  func.func @transform_3(%arg0: i32, %arg1: i32, %arg2: i32) -> (i32, i32) {
    %c0_i32 = arith.constant 0 : i32
    return %arg0, %arg1 : i32, i32
  }
}

</mosaic_0001>

<bundles_post_ra>
// kernel: tpu_custom_call.1
= control target key start
LH: loop header
LB: loop body
LE: loop exit
PB: predicated region body
PF: predicated region fallthrough
CT: control target
= control target key end

     0   :  { %8 = vsyncpa [#allocation3], 0  ;;  %s306_s0 = inlined_call_operand.vmem [shape: bf16[8,128], index: 0, kind: input, shape index: {}]   ;;  %s307_s1 = inlined_call_operand.hbm [shape: bf16[128,128], index: 1, kind: input, shape index: {}]   ;;  %s308_s2 = inlined_call_operand.vmem [shape: f32[8,1], index: 2, kind: input, shape index: {}]   ;;  %s309_s3 = inlined_call_operand.hbm [shape: f32[8,128], index: 3, kind: output, shape index: {}]  }
   0x1   :  { %9 = vsyncpa [#allocation4], 0  ;;  %s267_s12 = smov [#allocation2]  }
   0x2   :  { %s17_s13 = sshll.u32 %s267_s12, 4  ;;  %s18_s13 = int_to_ptr.vmem [resolvable:$true] %s17_s13 }
   0x3   :  { %s231_s14 = scalar_lea.vmem %s18_s13, 1024  ;;  %p236_p1 = scmp.lt.s32.totalorder %s18_s13, %s18_s13 }
   0x4   :  { %p232_p0 = scmp.ne.s32.totalorder %s18_s13, %s231_s14  ;;  %p237_p2 = scmp.lt.s32.totalorder %s231_s14, %s231_s14 }
   0x6   :  { %p238_p3 = por %p237_p2, %p236_p1 }
   0x8   :  { %p239_p4 = pnand %p238_p3, %p232_p0 }
   0xa   :  { %242 = shalt.err (!%p239_p4)
}
   0xb   :  { %s268_s15 = smov 64   ;;  %s269_s16 = smov 4  }
   0xc   :  { %23 = dma.hbm_to_vmem [thread:$0]  %s307_s1, 1024, %s18_s13, [#allocation3], %s268_s15, %s268_s15, %s269_s16  }
   0xd   :  { %263 = dma.done.wait [#allocation3], 1024  }
   0xe   :  { %264 = vsyncadd [#allocation3], 4294966272  ;;  %v270_v0 = vmov 0.0   ;;  %vm271_vm0 = vmmov 0   ;;  %v272_v1 = vmov 0   ;;  %v215_v2 = vld [vmem:[#allocation2 + $0x38] sm:$0xff]  }
   0xf   :  { %187 = vmatprep.subr.bf16.mxu0 %v270_v0  ;;  %203 = vmatprep.mubr.msk.bf16.mxu0 %vm271_vm0, %v270_v0  ;;  %v216_v3 = vld [vmem:[#allocation2 + $0x30] sm:$0xff]   ;;  %v217_v4 = vld [vmem:[#allocation2 + $0x28] sm:$0xff]   ;;  %v147_v5 = vld [vmem:[%s308_s2] sm:$0xff]  ;;  %s273_s2 = smov [#allocation5]  }
  0x10   :  { %214 = vset.pattern.permute.xlu0 %v272_v1  ;;  %188 = vmatpush3.bf16.msra.mxu0 %v215_v2  ;;  %v218_v6 = vld [vmem:[#allocation2 + $0x20] sm:$0xff]   ;;  %v219_v7 = vld [vmem:[#allocation2 + $0x18] sm:$0xff]   ;;  %v220_v8 = vld [vmem:[#allocation2 + $0x10] sm:$0xff]   ;;  %s161_s22 = sshll.u32 %s273_s2, 4  ;;  %s162_s22 = int_to_ptr.vmem [resolvable:$true] %s161_s22 }
  0x11   :  { %189 = vmatprep.subr.bf16.mxu0 %v270_v0  ;;  %150 = vperm.xlu0 %214, %v147_v5   ;;  %v221_v9 = vld [vmem:[#allocation2 + $0x8] sm:$0xff]   ;;  %v222_v10 = vld [vmem:[#allocation2] sm:$0xff]   ;;  %s243_s23 = scalar_lea.vmem %s162_s22, 128  ;;  %p248_p6 = scmp.lt.s32.totalorder %s162_s22, %s162_s22 }
  0x12   :  { %v36_v11 = vld [vmem:[%s306_s0] sm:$0xf]  ;;  %p244_p5 = scmp.ne.s32.totalorder %s162_s22, %s243_s23  ;;  %p249_p7 = scmp.lt.s32.totalorder %s243_s23, %s243_s23 }
  0x14   :  { %190 = vmatpush3.bf16.msra.mxu0 %v216_v3  ;;  %p250_p8 = por %p249_p7, %p248_p6 }
  0x15   :  { %191 = vmatprep.subr.bf16.mxu0 %v270_v0 }
  0x16   :  { %p251_p9 = pnand %p250_p8, %p244_p5 }
  0x18   :  { %192 = vmatpush3.bf16.msra.mxu0 %v217_v4 }
  0x19   :  { %193 = vmatprep.subr.bf16.mxu0 %v270_v0 }
  0x1c   :  { %194 = vmatpush3.bf16.msra.mxu0 %v218_v6 }
  0x1d   :  { %195 = vmatprep.subr.bf16.mxu0 %v270_v0 }
  0x20   :  { %196 = vmatpush3.bf16.msra.mxu0 %v219_v7 }
  0x21   :  { %197 = vmatprep.subr.bf16.mxu0 %v270_v0 }
  0x24   :  { %198 = vmatpush3.bf16.msra.mxu0 %v220_v8 }
  0x25   :  { %199 = vmatprep.subr.bf16.mxu0 %v270_v0 }
  0x28   :  { %200 = vmatpush3.bf16.msra.mxu0 %v221_v9 }
  0x29   :  { %201 = vmatprep.subr.bf16.mxu0 %v270_v0 }
  0x2c   :  { %202 = vmatpush3.bf16.msra.mxu0 %v222_v10 }
  0x2f   :  { %204 = vmatmul.mubr.bf16.vlgmr.msra.gmra.mxu0 %v36_v11 }
  0x8c   :  { %v151_v13 = vpop.permute.xlu0 %150 }
  0xef   :  { %v135_v12 = vpop.f32.mrf.mxu0 }
  0xf0   :  { %v153_v15 = vmul.f32 %v151_v13, %v135_v12 }
  0xf1   :  { %v205_v14 = vpop.f32.mrf.mxu0 }
  0xf2   :  { %154 = vst [vmem:[#allocation5] sm:$0xff] %v153_v15 }
  0xf3   :  { %v138_v16 = vpop.f32.mrf.mxu0 }
  0xf5   :  { %v206_v17 = vpop.f32.mrf.mxu0 }
  0xf6   :  { %254 = shalt.err (!%p251_p9)
}
  0xf7   :  { %164 = dma.vmem_to_hbm [thread:$0]  %s162_s22, 128, %s309_s3, [#allocation4]  }
  0xf8   :  { %265 = dma.done.wait [#allocation4], 128  }
  0xf9   :  { %266 = vsyncadd [#allocation4], 4294967168 }
  0xfa   :  { %168 = vsyncpa [#allocation3], 1 }
  0xfb   :  { %169 = vsyncpa [#allocation4], 1 }

</bundles_post_ra>
